<compile_context>
chip_gen: v5e
topology: v5e:2x2
jax: 0.10.0
libtpu: 0.0.40
codegen_flags: <defaults>
</compile_context>

<pallas_src>
import functools

import jax
import jax.numpy as jnp
from jax.experimental import pallas as pl
from jax.experimental.pallas import tpu as pltpu

IN_FEATURES = 16 * 48   # 768
HIDDEN = 256
LATENT_DIM = 128

# Max rows per batch tile. 2048 f32 rows -> ~2x6 MiB x-buffers + 2x1 MiB
# out-buffers + ~0.5 MiB resident bf16 weights ~= 15 MiB of VMEM.
DEFAULT_BLOCK_B = 2048
_VMEM_LIMIT_BYTES = 32 * 1024 * 1024  # safe on v5e/v6e (128 MiB) and v7x (64 MiB/TC)


def _round_up(n, m):
    return ((n + m - 1) // m) * m


def _mlp_kernel(x_ref, w1_ref, b1_ref, w2_ref, b2_ref, out_ref, *, mxu_dtype):
    # Fused Linear(768->256) + ReLU + Linear(256->128); f32 MXU accumulation.
    x = x_ref[...].astype(mxu_dtype)
    h = jnp.dot(x, w1_ref[...], preferred_element_type=jnp.float32)
    h = jnp.maximum(h + b1_ref[...], 0.0)          # (TB, 256) + (1, 256), ReLU
    o = jnp.dot(h.astype(mxu_dtype), w2_ref[...], preferred_element_type=jnp.float32)
    out_ref[...] = (o + b2_ref[...]).astype(out_ref.dtype)   # (TB, 128) + (1, 128)


def waveform_encoder(x, w1, b1, w2, b2, *,
                     block_b=DEFAULT_BLOCK_B, mxu_dtype=jnp.bfloat16):
    """x: (B, 16, 48) float32 -> (B, 128) float32.

    w1: (768, 256), b1: (1, 256), w2: (256, 128), b2: (1, 128)  (pre-transposed
    vs. PyTorch's (out, in) layout; mathematically identical to x @ W.T + b).
    """
    B = x.shape[0]
    x_flat = jnp.reshape(x, (B, IN_FEATURES))      # nn.Flatten()

    # Batch tile: multiple of 8 (f32 sublane), capped at block_b, and capped at
    # ceil(B/2) so the batch grid has >= 2 steps whenever B > 8 (v7x megacore).
    tb = max(8, min(block_b, _round_up(pl.cdiv(max(B, 1), 2), 8)))
    grid = (pl.cdiv(B, tb),)                        # partial last tile clipped by Pallas

    # Pre-cast weights once so the MXU sees its native dtype; biases stay f32
    # (added after the f32-accumulated dot).
    w1c = w1 if w1.dtype == mxu_dtype else w1.astype(mxu_dtype)
    w2c = w2 if w2.dtype == mxu_dtype else w2.astype(mxu_dtype)

    weight_bytes = (w1c.size * w1c.dtype.itemsize + w2c.size * w2c.dtype.itemsize
                    + b1.size * b1.dtype.itemsize + b2.size * b2.dtype.itemsize)
    cost = pl.CostEstimate(
        flops=2 * B * (IN_FEATURES * HIDDEN + HIDDEN * LATENT_DIM),
        bytes_accessed=B * (IN_FEATURES + LATENT_DIM) * 4 + weight_bytes,
        transcendentals=0,
    )

    kernel = functools.partial(_mlp_kernel, mxu_dtype=mxu_dtype)

    return pl.pallas_call(
        kernel,
        out_shape=jax.ShapeDtypeStruct((B, LATENT_DIM), jnp.float32),
        grid=grid,
        in_specs=[
            # Streamed per grid step (auto double-buffered).
            pl.BlockSpec((tb, IN_FEATURES), lambda i: (i, 0)),
            # Weights / biases: constant block index -> VMEM-resident, DMA'd once.
            pl.BlockSpec((IN_FEATURES, HIDDEN), lambda i: (0, 0)),
            pl.BlockSpec((1, HIDDEN), lambda i: (0, 0)),
            pl.BlockSpec((HIDDEN, LATENT_DIM), lambda i: (0, 0)),
            pl.BlockSpec((1, LATENT_DIM), lambda i: (0, 0)),
        ],
        out_specs=pl.BlockSpec((tb, LATENT_DIM), lambda i: (i, 0)),
        compiler_params=pltpu.CompilerParams(
            dimension_semantics=("parallel",),
            vmem_limit_bytes=_VMEM_LIMIT_BYTES,
        ),
        cost_estimate=cost,
    )(x_flat, w1c, b1, w2c, b2)


def init_params(key):
    """Deterministic synthetic init (uniform, ~ PyTorch Linear default scale)."""
    k1, k2, k3, k4 = jax.random.split(key, 4)
    bound1 = 1.0 / (IN_FEATURES ** 0.5)
    bound2 = 1.0 / (HIDDEN ** 0.5)
    w1 = jax.random.uniform(k1, (IN_FEATURES, HIDDEN), jnp.float32, -bound1, bound1)
    b1 = jax.random.uniform(k2, (1, HIDDEN), jnp.float32, -bound1, bound1)
    w2 = jax.random.uniform(k3, (HIDDEN, LATENT_DIM), jnp.float32, -bound2, bound2)
    b2 = jax.random.uniform(k4, (1, LATENT_DIM), jnp.float32, -bound2, bound2)
    return w1, b1, w2, b2


def _reference(x, w1, b1, w2, b2):
    x_flat = jnp.reshape(x, (x.shape[0], IN_FEATURES))
    h = jnp.maximum(x_flat @ w1 + b1, 0.0)
    return h @ w2 + b2


if __name__ == "__main__":
    key = jax.random.PRNGKey(0)
    k_x, k_x2, k_p = jax.random.split(key, 3)
    w1, b1, w2, b2 = init_params(k_p)

    # Small-batch case (B=2): exact f32 MXU path, tight tolerance.
    B = 2
    x = jax.random.normal(k_x, (B, 16, 48), jnp.float32)
    ref = _reference(x, w1, b1, w2, b2)

    out_f32 = jax.block_until_ready(
        waveform_encoder(x, w1, b1, w2, b2, mxu_dtype=jnp.float32))
    assert out_f32.shape == (B, LATENT_DIM), out_f32.shape
    assert jnp.allclose(out_f32, ref, atol=1e-4, rtol=1e-4), "mismatch (f32 MXU, B=2)"

    # Default bf16-fed MXU path (f32 accumulation): looser tolerance.
    out_bf16 = jax.block_until_ready(waveform_encoder(x, w1, b1, w2, b2))
    assert jnp.allclose(out_bf16, ref, atol=3e-2, rtol=3e-2), "mismatch (bf16 MXU, B=2)"

    # Multi-tile case with a partial last tile: B=300, block_b=192 ->
    # tb=152, grid=(2,), last tile covers rows 152..299 (clipped, no padding).
    B2 = 300
    x2 = jax.random.normal(k_x2, (B2, 16, 48), jnp.float32)
    ref2 = _reference(x2, w1, b1, w2, b2)
    out2 = jax.block_until_ready(waveform_encoder(x2, w1, b1, w2, b2, block_b=192))
    assert out2.shape == (B2, LATENT_DIM), out2.shape
    assert jnp.allclose(out2, ref2, atol=3e-2, rtol=3e-2), "mismatch (bf16 MXU, B=300)"

    print("KERNEL_OK")
</pallas_src>

<mosaic_0001>
module attributes {stable_mosaic.version = 11 : i64} {
  func.func @_mlp_kernel(%arg0: i32, %arg1: memref<8x768xf32, #tpu.memory_space<vmem>>, %arg2: memref<768x256xf32, #tpu.memory_space<vmem>>, %arg3: memref<1x256xf32, #tpu.memory_space<vmem>>, %arg4: memref<256x128xf32, #tpu.memory_space<vmem>>, %arg5: memref<1x128xf32, #tpu.memory_space<vmem>>, %arg6: memref<8x128xf32, #tpu.memory_space<vmem>>) attributes {dimension_semantics = [#tpu.dimension_semantics<parallel>], iteration_bounds = array<i64: 1>, scalar_prefetch = 0 : i64, scratch_operands = 0 : i64, tpu.core_type = #tpu.core_type<tc>, window_params = [{transform_indices = @transform_0, window_bounds = array<i64: 8, 768>}, {pipeline_mode = #tpu.pipeline_mode<synchronous>, transform_indices = @transform_1, window_bounds = array<i64: 768, 256>}, {pipeline_mode = #tpu.pipeline_mode<synchronous>, transform_indices = @transform_2, window_bounds = array<i64: 1, 256>}, {pipeline_mode = #tpu.pipeline_mode<synchronous>, transform_indices = @transform_3, window_bounds = array<i64: 256, 128>}, {pipeline_mode = #tpu.pipeline_mode<synchronous>, transform_indices = @transform_4, window_bounds = array<i64: 1, 128>}, {transform_indices = @transform_5, window_bounds = array<i64: 8, 128>}]} {
    %c0 = arith.constant 0 : index
    %c0_0 = arith.constant 0 : index
    %0 = vector.load %arg1[%c0, %c0_0] : memref<8x768xf32, #tpu.memory_space<vmem>>, vector<8x768xf32>
    %c0_1 = arith.constant 0 : index
    %c0_2 = arith.constant 0 : index
    %1 = vector.load %arg2[%c0_1, %c0_2] : memref<768x256xf32, #tpu.memory_space<vmem>>, vector<768x256xf32>
    %cst = arith.constant dense<0.000000e+00> : vector<8x256xf32>
    %2 = tpu.matmul %0, %1, %cst {dimension_numbers = #tpu.dot_dimension_numbers<[1], [0], [0], [1], [0, 0, 1, 1], [], []>} : vector<8x768xf32>, vector<768x256xf32>, vector<8x256xf32> -> vector<8x256xf32>
    %c0_3 = arith.constant 0 : index
    %c0_4 = arith.constant 0 : index
    %3 = vector.load %arg3[%c0_3, %c0_4] : memref<1x256xf32, #tpu.memory_space<vmem>>, vector<1x256xf32>
    %4 = vector.broadcast %3 : vector<1x256xf32> to vector<8x256xf32>
    %5 = arith.addf %2, %4 : vector<8x256xf32>
    %cst_5 = arith.constant 0.000000e+00 : f32
    %6 = vector.broadcast %cst_5 : f32 to vector<8x256xf32>
    %7 = arith.maximumf %5, %6 : vector<8x256xf32>
    %c0_6 = arith.constant 0 : index
    %c0_7 = arith.constant 0 : index
    %8 = vector.load %arg4[%c0_6, %c0_7] : memref<256x128xf32, #tpu.memory_space<vmem>>, vector<256x128xf32>
    %cst_8 = arith.constant dense<0.000000e+00> : vector<8x128xf32>
    %9 = tpu.matmul %7, %8, %cst_8 {dimension_numbers = #tpu.dot_dimension_numbers<[1], [0], [0], [1], [0, 0, 1, 1], [], []>} : vector<8x256xf32>, vector<256x128xf32>, vector<8x128xf32> -> vector<8x128xf32>
    %c0_9 = arith.constant 0 : index
    %c0_10 = arith.constant 0 : index
    %10 = vector.load %arg5[%c0_9, %c0_10] : memref<1x128xf32, #tpu.memory_space<vmem>>, vector<1x128xf32>
    %11 = vector.broadcast %10 : vector<1x128xf32> to vector<8x128xf32>
    %12 = arith.addf %9, %11 : vector<8x128xf32>
    %c0_11 = arith.constant 0 : index
    %c0_12 = arith.constant 0 : index
    %13 = vector.load %arg6[%c0_11, %c0_12] : memref<8x128xf32, #tpu.memory_space<vmem>>, vector<8x128xf32>
    tpu.vector_store %arg6[%c0_11, %c0_12], %12 {strides = array<i32>} : memref<8x128xf32, #tpu.memory_space<vmem>>, vector<8x128xf32>,
    return
  }
  func.func @transform_0(%arg0: i32) -> (i32, i32) {
    %c0_i32 = arith.constant 0 : i32
    %c0_i32_0 = arith.constant 0 : i32
    return %arg0, %c0_i32 : i32, i32
  }
  func.func @transform_1(%arg0: i32) -> (i32, i32) {
    %c0_i32 = arith.constant 0 : i32
    %c0_i32_0 = arith.constant 0 : i32
    %c0_i32_1 = arith.constant 0 : i32
    return %c0_i32, %c0_i32_0 : i32, i32
  }
  func.func @transform_2(%arg0: i32) -> (i32, i32) {
    %c0_i32 = arith.constant 0 : i32
    %c0_i32_0 = arith.constant 0 : i32
    %c0_i32_1 = arith.constant 0 : i32
    return %c0_i32, %c0_i32_0 : i32, i32
  }
  func.func @transform_3(%arg0: i32) -> (i32, i32) {
    %c0_i32 = arith.constant 0 : i32
    %c0_i32_0 = arith.constant 0 : i32
    %c0_i32_1 = arith.constant 0 : i32
    return %c0_i32, %c0_i32_0 : i32, i32
  }
  func.func @transform_4(%arg0: i32) -> (i32, i32) {
    %c0_i32 = arith.constant 0 : i32
    %c0_i32_0 = arith.constant 0 : i32
    %c0_i32_1 = arith.constant 0 : i32
    return %c0_i32, %c0_i32_0 : i32, i32
  }
  func.func @transform_5(%arg0: i32) -> (i32, i32) {
    %c0_i32 = arith.constant 0 : i32
    %c0_i32_0 = arith.constant 0 : i32
    return %arg0, %c0_i32 : i32, i32
  }
}

</mosaic_0001>

<bundles_post_ra>
// kernel: tpu_custom_call.1
= control target key start
LH: loop header
LB: loop body
LE: loop exit
PB: predicated region body
PF: predicated region fallthrough
CT: control target
= control target key end

     0   :  { %10 = vsyncpa [#allocation3], 0  ;;  %s890_s0 = inlined_call_operand.hbm [shape: f32[2,768], index: 0, kind: input, shape index: {}]   ;;  %s891_s1 = inlined_call_operand.hbm [shape: f32[768,256], index: 1, kind: input, shape index: {}]   ;;  %s892_s2 = inlined_call_operand.hbm [shape: f32[1,256], index: 2, kind: input, shape index: {}]   ;;  %s893_s3 = inlined_call_operand.hbm [shape: f32[256,128], index: 3, kind: input, shape index: {}]   ;;  %s894_s4 = inlined_call_operand.vmem [shape: f32[1,128], index: 4, kind: input, shape index: {}]   ;;  %s895_s5 = inlined_call_operand.hbm [shape: f32[2,128], index: 5, kind: output, shape index: {}]  }
   0x1   :  { %11 = vsyncpa [#allocation6], 0 }
   0x2   :  { %12 = vsyncpa [#allocation9], 0 }
   0x3   :  { %13 = vsyncpa [#allocation4], 0  ;;  %s31_s20 = sshll.u32 %s891_s1, 4  ;;  %s32_s20 = int_to_ptr.hbm [resolvable:$true] %s31_s20 }
   0x4   :  { %17 = vsyncadd [#allocation3], 576  ;;  %s805_s21 = smov [#allocation5]   ;;  %s18_s25 = sshll.u32 %s890_s0, 4  ;;  %s19_s25 = int_to_ptr.hbm [resolvable:$true] %s18_s25 }
   0x5   :  { %s33_s22 = sshll.u32 %s805_s21, 4  ;;  %s806_s26 = smov 256   ;;  %s34_s22 = int_to_ptr.vmem [resolvable:$true] %s33_s22 }
   0x6   :  { %s807_s27 = smov 16   ;;  %s808_s28 = smov [#allocation2]  }
   0x7   :  { %39 = dma.hbm_to_vmem [thread:$0]  %s32_s20, 24576, %s34_s22, [#allocation6], %s806_s26, %s806_s26, %s807_s27  }
   0x8   :  { %s20_s29 = sshll.u32 %s808_s28, 4  ;;  %s809_s30 = smov 192   ;;  %s21_s29 = int_to_ptr.vmem [resolvable:$true] %s20_s29 }
   0x9   :  { %s810_s6 = smov 12   ;;  %s45_s8 = sshll.u32 %s892_s2, 4  ;;  %s46_s8 = int_to_ptr.hbm [resolvable:$true] %s45_s8 }
   0xa   :  { %26 = dma.hbm_to_vmem [thread:$0]  %s19_s25, 192, %s21_s29, [#allocation3], %s809_s30, %s809_s30, %s810_s6  }
   0xb   :  { %s811_s9 = smov [#allocation7]   ;;  %s55_s12 = sshll.u32 %s893_s3, 4  ;;  %s56_s12 = int_to_ptr.hbm [resolvable:$true] %s55_s12 }
   0xc   :  { %s47_s10 = sshll.u32 %s811_s9, 4  ;;  %s812_s13 = smov [#allocation8]   ;;  %s48_s10 = int_to_ptr.vmem [resolvable:$true] %s47_s10 }
   0xd   :  { %50 = dma.hbm_to_vmem [thread:$0]  %s46_s8, 32, %s48_s10, [#allocation6]  }
   0xe   :  { %s57_s14 = sshll.u32 %s812_s13, 4  ;;  %s813_s15 = smov 128   ;;  %s58_s14 = int_to_ptr.vmem [resolvable:$true] %s57_s14 }
   0xf   :  { %s814_s16 = smov 8  }
  0x10   :  { %63 = dma.hbm_to_vmem [thread:$0]  %s56_s12, 4096, %s58_s14, [#allocation9], %s813_s15, %s813_s15, %s814_s16  }
  0x11   :  { %797 = dma.done.wait [#allocation3], 768  }
  0x12   :  { %798 = vsyncadd [#allocation3], 4294966528 }
  0x13   :  { %799 = dma.done.wait [#allocation6], 24608  }
  0x14   :  { %800 = vsyncadd [#allocation6], 4294942688 }
  0x15   :  { %801 = dma.done.wait [#allocation9], 4096  }
  0x16   :  { %802 = vsyncadd [#allocation9], 4294963200  ;;  %v184_v0 = vld [vmem:[#allocation5 + $0x2f0] sm:$0xff]  ;;  %v182_v2 = vld [vmem:[#allocation5 + $0x2e0] sm:$0xff] }
  0x17   :  { %v120_v1 = vld [vmem:[#allocation5 + $0xf0] sm:$0xff]  ;;  %363 = vmatpush.msra.mxu2 %v184_v0  ;;  %v118_v4 = vld [vmem:[#allocation5 + $0xe0] sm:$0xff]  ;;  %v121_v62 = vld [vmem:[#allocation5 + $0xf8] sm:$0xff] }
  0x18   :  { %323 = vmatpush.msra.mxu0 %v120_v1  ;;  %v216_v3 = vld [vmem:[#allocation5 + $0x3f0] sm:$0xff]  ;;  %v214_v7 = vld [vmem:[#allocation5 + $0x3e0] sm:$0xff]  ;;  %v153_v1 = vld [vmem:[#allocation5 + $0x1f8] sm:$0xff] }
  0x19   :  { %v152_v5 = vld [vmem:[#allocation5 + $0x1f0] sm:$0xff]  ;;  %383 = vmatpush.msra.mxu3 %v216_v3  ;;  %364 = vmatpush.msra.mxu2 %v182_v2  ;;  %v150_v9 = vld [vmem:[#allocation5 + $0x1e0] sm:$0xff]  ;;  %v119_v2 = vld [vmem:[#allocation5 + $0xe8] sm:$0xff] }
  0x1a   :  { %343 = vmatpush.msra.mxu1 %v152_v5  ;;  %v180_v6 = vld [vmem:[#allocation5 + $0x2d0] sm:$0xff]  ;;  %324 = vmatpush.msra.mxu0 %v118_v4  ;;  %v178_v11 = vld [vmem:[#allocation5 + $0x2c0] sm:$0xff] }
  0x1b   :  { %v116_v8 = vld [vmem:[#allocation5 + $0xd0] sm:$0xff]  ;;  %384 = vmatpush.msra.mxu3 %v214_v7  ;;  %v114_v12 = vld [vmem:[#allocation5 + $0xc0] sm:$0xff]  ;;  %365 = vmatpush.msra.mxu2 %v180_v6  ;;  %v117_v6 = vld [vmem:[#allocation5 + $0xd8] sm:$0xff] }
  0x1c   :  { %v212_v10 = vld [vmem:[#allocation5 + $0x3d0] sm:$0xff]  ;;  %344 = vmatpush.msra.mxu1 %v150_v9  ;;  %325 = vmatpush.msra.mxu0 %v116_v8  ;;  %v210_v14 = vld [vmem:[#allocation5 + $0x3c0] sm:$0xff]  ;;  %v151_v7 = vld [vmem:[#allocation5 + $0x1e8] sm:$0xff] }
  0x1d   :  { %v148_v13 = vld [vmem:[#allocation5 + $0x1d0] sm:$0xff]  ;;  %v146_v15 = vld [vmem:[#allocation5 + $0x1c0] sm:$0xff]  ;;  %385 = vmatpush.msra.mxu3 %v212_v10  ;;  %366 = vmatpush.msra.mxu2 %v178_v11  ;;  %v115_v10 = vld [vmem:[#allocation5 + $0xc8] sm:$0xff] }
  0x1e   :  { %345 = vmatpush.msra.mxu1 %v148_v13  ;;  %v176_v16 = vld [vmem:[#allocation5 + $0x2b0] sm:$0xff]  ;;  %326 = vmatpush.msra.mxu0 %v114_v12  ;;  %v174_v20 = vld [vmem:[#allocation5 + $0x2a0] sm:$0xff]  ;;  %v149_v11 = vld [vmem:[#allocation5 + $0x1d8] sm:$0xff] }
  0x1f   :  { %v112_v17 = vld [vmem:[#allocation5 + $0xb0] sm:$0xff]  ;;  %386 = vmatpush.msra.mxu3 %v210_v14  ;;  %v110_v21 = vld [vmem:[#allocation5 + $0xa0] sm:$0xff]  ;;  %367 = vmatpush.msra.mxu2 %v176_v16  ;;  %v113_v14 = vld [vmem:[#allocation5 + $0xb8] sm:$0xff] }
  0x20   :  { %v208_v18 = vld [vmem:[#allocation5 + $0x3b0] sm:$0xff]  ;;  %346 = vmatpush.msra.mxu1 %v146_v15  ;;  %327 = vmatpush.msra.mxu0 %v112_v17  ;;  %v206_v22 = vld [vmem:[#allocation5 + $0x3a0] sm:$0xff]  ;;  %v147_v15 = vld [vmem:[#allocation5 + $0x1c8] sm:$0xff] }
  0x21   :  { %v144_v19 = vld [vmem:[#allocation5 + $0x1b0] sm:$0xff]  ;;  %v142_v23 = vld [vmem:[#allocation5 + $0x1a0] sm:$0xff]  ;;  %387 = vmatpush.msra.mxu3 %v208_v18  ;;  %368 = vmatpush.msra.mxu2 %v174_v20  ;;  %v111_v18 = vld [vmem:[#allocation5 + $0xa8] sm:$0xff] }
  0x22   :  { %347 = vmatpush.msra.mxu1 %v144_v19  ;;  %v172_v24 = vld [vmem:[#allocation5 + $0x290] sm:$0xff]  ;;  %328 = vmatpush.msra.mxu0 %v110_v21  ;;  %v170_v28 = vld [vmem:[#allocation5 + $0x280] sm:$0xff]  ;;  %v145_v19 = vld [vmem:[#allocation5 + $0x1b8] sm:$0xff] }
  0x23   :  { %v108_v25 = vld [vmem:[#allocation5 + $0x90] sm:$0xff]  ;;  %388 = vmatpush.msra.mxu3 %v206_v22  ;;  %v106_v29 = vld [vmem:[#allocation5 + $0x80] sm:$0xff]  ;;  %369 = vmatpush.msra.mxu2 %v172_v24  ;;  %v109_v22 = vld [vmem:[#allocation5 + $0x98] sm:$0xff] }
  0x24   :  { %v204_v26 = vld [vmem:[#allocation5 + $0x390] sm:$0xff]  ;;  %348 = vmatpush.msra.mxu1 %v142_v23  ;;  %329 = vmatpush.msra.mxu0 %v108_v25  ;;  %v202_v30 = vld [vmem:[#allocation5 + $0x380] sm:$0xff]  ;;  %v143_v23 = vld [vmem:[#allocation5 + $0x1a8] sm:$0xff] }
  0x25   :  { %v140_v27 = vld [vmem:[#allocation5 + $0x190] sm:$0xff]  ;;  %v138_v31 = vld [vmem:[#allocation5 + $0x180] sm:$0xff]  ;;  %389 = vmatpush.msra.mxu3 %v204_v26  ;;  %370 = vmatpush.msra.mxu2 %v170_v28  ;;  %v86_v28 = vld [vmem:[#allocation2 + $0x18] sm:$0xff] }
  0x26   :  { %349 = vmatpush.msra.mxu1 %v140_v27  ;;  %v168_v32 = vld [vmem:[#allocation5 + $0x270] sm:$0xff]  ;;  %330 = vmatpush.msra.mxu0 %v106_v29  ;;  %v166_v36 = vld [vmem:[#allocation5 + $0x260] sm:$0xff]  ;;  %300 = vst [vmem:[#allocation1 + $0x2] ss:$4 sm:$0xff] %v86_v28 }
  0x27   :  { %v104_v33 = vld [vmem:[#allocation5 + $0x70] sm:$0xff]  ;;  %390 = vmatpush.msra.mxu3 %v202_v30  ;;  %v102_v37 = vld [vmem:[#allocation5 + $0x60] sm:$0xff]  ;;  %371 = vmatpush.msra.mxu2 %v168_v32  ;;  %v107_v30 = vld [vmem:[#allocation5 + $0x88] sm:$0xff] }
  0x28   :  { %v200_v34 = vld [vmem:[#allocation5 + $0x370] sm:$0xff]  ;;  %350 = vmatpush.msra.mxu1 %v138_v31  ;;  %331 = vmatpush.msra.mxu0 %v104_v33  ;;  %v198_v38 = vld [vmem:[#allocation5 + $0x360] sm:$0xff]  ;;  %v141_v31 = vld [vmem:[#allocation5 + $0x198] sm:$0xff] }
  0x29   :  { %v136_v35 = vld [vmem:[#allocation5 + $0x170] sm:$0xff]  ;;  %v134_v39 = vld [vmem:[#allocation5 + $0x160] sm:$0xff]  ;;  %391 = vmatpush.msra.mxu3 %v200_v34  ;;  %372 = vmatpush.msra.mxu2 %v166_v36  ;;  %v105_v34 = vld [vmem:[#allocation5 + $0x78] sm:$0xff] }
  0x2a   :  { %351 = vmatpush.msra.mxu1 %v136_v35  ;;  %v164_v40 = vld [vmem:[#allocation5 + $0x250] sm:$0xff]  ;;  %332 = vmatpush.msra.mxu0 %v102_v37  ;;  %v162_v44 = vld [vmem:[#allocation5 + $0x240] sm:$0xff]  ;;  %v139_v35 = vld [vmem:[#allocation5 + $0x188] sm:$0xff] }
  0x2b   :  { %v100_v41 = vld [vmem:[#allocation5 + $0x50] sm:$0xff]  ;;  %392 = vmatpush.msra.mxu3 %v198_v38  ;;  %v98_v45 = vld [vmem:[#allocation5 + $0x40] sm:$0xff]  ;;  %373 = vmatpush.msra.mxu2 %v164_v40  ;;  %v103_v38 = vld [vmem:[#allocation5 + $0x68] sm:$0xff] }
  0x2c   :  { %v196_v42 = vld [vmem:[#allocation5 + $0x350] sm:$0xff]  ;;  %352 = vmatpush.msra.mxu1 %v134_v39  ;;  %333 = vmatpush.msra.mxu0 %v100_v41  ;;  %v194_v46 = vld [vmem:[#allocation5 + $0x340] sm:$0xff]  ;;  %v137_v39 = vld [vmem:[#allocation5 + $0x178] sm:$0xff] }
  0x2d   :  { %v132_v43 = vld [vmem:[#allocation5 + $0x150] sm:$0xff]  ;;  %v130_v47 = vld [vmem:[#allocation5 + $0x140] sm:$0xff]  ;;  %393 = vmatpush.msra.mxu3 %v196_v42  ;;  %374 = vmatpush.msra.mxu2 %v162_v44  ;;  %v101_v42 = vld [vmem:[#allocation5 + $0x58] sm:$0xff] }
  0x2e   :  { %353 = vmatpush.msra.mxu1 %v132_v43  ;;  %v160_v48 = vld [vmem:[#allocation5 + $0x230] sm:$0xff]  ;;  %334 = vmatpush.msra.mxu0 %v98_v45  ;;  %v158_v52 = vld [vmem:[#allocation5 + $0x220] sm:$0xff]  ;;  %v135_v43 = vld [vmem:[#allocation5 + $0x168] sm:$0xff] }
  0x2f   :  { %v96_v49 = vld [vmem:[#allocation5 + $0x30] sm:$0xff]  ;;  %394 = vmatpush.msra.mxu3 %v194_v46  ;;  %v94_v53 = vld [vmem:[#allocation5 + $0x20] sm:$0xff]  ;;  %375 = vmatpush.msra.mxu2 %v160_v48  ;;  %v83_v44 = vld [vmem:[#allocation2 + $0x8] sm:$0xf] }
  0x30   :  { %v192_v50 = vld [vmem:[#allocation5 + $0x330] sm:$0xff]  ;;  %354 = vmatpush.msra.mxu1 %v130_v47  ;;  %335 = vmatpush.msra.mxu0 %v96_v49  ;;  %v190_v54 = vld [vmem:[#allocation5 + $0x320] sm:$0xff]  ;;  %304 = vst [vmem:[#allocation1 + $0x20] ss:$4 sm:$0xff] %v83_v44  ;;  %v99_v48 = vld [vmem:[#allocation5 + $0x48] sm:$0xff] }
  0x31   :  { %v128_v51 = vld [vmem:[#allocation5 + $0x130] sm:$0xff]  ;;  %v126_v55 = vld [vmem:[#allocation5 + $0x120] sm:$0xff]  ;;  %395 = vmatpush.msra.mxu3 %v192_v50  ;;  %376 = vmatpush.msra.mxu2 %v158_v52  ;;  %v133_v49 = vld [vmem:[#allocation5 + $0x158] sm:$0xff] }
  0x32   :  { %355 = vmatpush.msra.mxu1 %v128_v51  ;;  %v156_v56 = vld [vmem:[#allocation5 + $0x210] sm:$0xff]  ;;  %336 = vmatpush.msra.mxu0 %v94_v53  ;;  %v154_v60 = vld [vmem:[#allocation5 + $0x200] sm:$0xff]  ;;  %v89_v53 = vld [vmem:[#allocation2 + $0x2c] sm:$0xf] }
  0x33   :  { %v92_v57 = vld [vmem:[#allocation5 + $0x10] sm:$0xff]  ;;  %396 = vmatpush.msra.mxu3 %v190_v54  ;;  %v90_v61 = vld [vmem:[#allocation5] sm:$0xff]  ;;  %377 = vmatpush.msra.mxu2 %v156_v56  ;;  %v97_v54 = vld [vmem:[#allocation5 + $0x38] sm:$0xff]  ;;  %310 = vst [vmem:[#allocation1 + $0x23] ss:$4 sm:$0xff] %v89_v53 }
  0x34   :  { %v188_v58 = vld [vmem:[#allocation5 + $0x310] sm:$0xff]  ;;  %356 = vmatpush.msra.mxu1 %v126_v55  ;;  %337 = vmatpush.msra.mxu0 %v92_v57  ;;  %v186_v63 = vld [vmem:[#allocation5 + $0x300] sm:$0xff]  ;;  %v131_v55 = vld [vmem:[#allocation5 + $0x148] sm:$0xff] }
  0x35   :  { %v124_v59 = vld [vmem:[#allocation5 + $0x110] sm:$0xff]  ;;  %397 = vmatpush.msra.mxu3 %v188_v58  ;;  %378 = vmatpush.msra.mxu2 %v154_v60  ;;  %v122_v3 = vld [vmem:[#allocation5 + $0x100] sm:$0xff]  ;;  %v95_v58 = vld [vmem:[#allocation5 + $0x28] sm:$0xff] }
  0x36   :  { %357 = vmatpush.msra.mxu1 %v124_v59  ;;  %v248_v0 = vld [vmem:[#allocation5 + $0x4f0] sm:$0xff]  ;;  %338 = vmatpush.msra.mxu0 %v90_v61  ;;  %v246_v4 = vld [vmem:[#allocation5 + $0x4e0] sm:$0xff]  ;;  %v129_v59 = vld [vmem:[#allocation5 + $0x138] sm:$0xff] }
  0x37   :  { %443 = vmatpush.msrb.mxu2 %v121_v62  ;;  %398 = vmatpush.msra.mxu3 %v186_v63  ;;  %v280_v5 = vld [vmem:[#allocation5 + $0x5f0] sm:$0xff]  ;;  %v278_v9 = vld [vmem:[#allocation5 + $0x5e0] sm:$0xff]  ;;  %v93_v62 = vld [vmem:[#allocation5 + $0x18] sm:$0xff] }
  0x38   :  { %403 = vmatpush.msrb.mxu0 %v248_v0  ;;  %358 = vmatpush.msra.mxu1 %v122_v3  ;;  %v244_v8 = vld [vmem:[#allocation5 + $0x4d0] sm:$0xff]  ;;  %v242_v12 = vld [vmem:[#allocation5 + $0x4c0] sm:$0xff]  ;;  %v127_v63 = vld [vmem:[#allocation5 + $0x128] sm:$0xff] }
  0x39   :  { %463 = vmatpush.msrb.mxu3 %v153_v1  ;;  %444 = vmatpush.msrb.mxu2 %v119_v2  ;;  %v276_v13 = vld [vmem:[#allocation5 + $0x5d0] sm:$0xff]  ;;  %v274_v17 = vld [vmem:[#allocation5 + $0x5c0] sm:$0xff]  ;;  %v91_v2 = vld [vmem:[#allocation5 + $0x8] sm:$0xff] }
  0x3a   :  { %404 = vmatpush.msrb.mxu0 %v246_v4  ;;  %423 = vmatpush.msrb.mxu1 %v280_v5  ;;  %v240_v16 = vld [vmem:[#allocation5 + $0x4b0] sm:$0xff]  ;;  %v238_v20 = vld [vmem:[#allocation5 + $0x4a0] sm:$0xff]  ;;  %v125_v3 = vld [vmem:[#allocation5 + $0x118] sm:$0xff] }
  0x3b   :  { %445 = vmatpush.msrb.mxu2 %v117_v6  ;;  %464 = vmatpush.msrb.mxu3 %v151_v7  ;;  %v272_v21 = vld [vmem:[#allocation5 + $0x5b0] sm:$0xff]  ;;  %v84_v26 = vld [vmem:[#allocation2 + $0xc] sm:$0xff]  ;;  %v85_v45 = vld [vmem:[#allocation2 + $0x14] sm:$0xf] }
  0x3c   :  { %405 = vmatpush.msrb.mxu0 %v244_v8  ;;  %424 = vmatpush.msrb.mxu1 %v278_v9  ;;  %v236_v24 = vld [vmem:[#allocation5 + $0x490] sm:$0xff]  ;;  %v270_v27 = vld [vmem:[#allocation5 + $0x5a0] sm:$0xff]  ;;  %298 = vst [vmem:[#allocation1 + $0x1] ss:$4 sm:$0xff] %v84_v26  ;;  %v249_v6 = vld [vmem:[#allocation5 + $0x4f8] sm:$0xff] }
  0x3d   :  { %446 = vmatpush.msrb.mxu2 %v115_v10  ;;  %465 = vmatpush.msrb.mxu3 %v149_v11  ;;  %v82_v25 = vld [vmem:[#allocation2] sm:$0xff]  ;;  %v234_v32 = vld [vmem:[#allocation5 + $0x480] sm:$0xff]  ;;  %306 = vst [vmem:[#allocation1 + $0x21] ss:$4 sm:$0xff] %v85_v45  ;;  %v123_v8 = vld [vmem:[#allocation5 + $0x108] sm:$0xff] }
  0x3e   :  { %406 = vmatpush.msrb.mxu0 %v242_v12  ;;  %425 = vmatpush.msrb.mxu1 %v276_v13  ;;  %v88_v29 = vld [vmem:[#allocation2 + $0x24] sm:$0xff]  ;;  %296 = vst [vmem:[#allocation1] ss:$4 sm:$0xff] %v82_v25  ;;  %v266_v37 = vld [vmem:[#allocation5 + $0x580] sm:$0xff]  ;;  %v87_v50 = vld [vmem:[#allocation2 + $0x20] sm:$0xf] }
  0x3f   :  { %447 = vmatpush.msrb.mxu2 %v113_v14  ;;  %466 = vmatpush.msrb.mxu3 %v147_v15  ;;  %v268_v33 = vld [vmem:[#allocation5 + $0x590] sm:$0xff]  ;;  %302 = vst [vmem:[#allocation1 + $0x3] ss:$4 sm:$0xff] %v88_v29  ;;  %v230_v40 = vld [vmem:[#allocation5 + $0x460] sm:$0xff]  ;;  %v185_v11 = vld [vmem:[#allocation5 + $0x2f8] sm:$0xff] }
  0x40   :  { %407 = vmatpush.msrb.mxu0 %v240_v16  ;;  %426 = vmatpush.msrb.mxu1 %v274_v17  ;;  %v232_v36 = vld [vmem:[#allocation5 + $0x470] sm:$0xff]  ;;  %v262_v47 = vld [vmem:[#allocation5 + $0x560] sm:$0xff]  ;;  %308 = vst [vmem:[#allocation1 + $0x22] ss:$4 sm:$0xff] %v87_v50  ;;  %v247_v12 = vld [vmem:[#allocation5 + $0x4e8] sm:$0xff] }
  0x41   :  { %448 = vmatpush.msrb.mxu2 %v111_v18  ;;  %467 = vmatpush.msrb.mxu3 %v145_v19  ;;  %v264_v41 = vld [vmem:[#allocation5 + $0x570] sm:$0xff]  ;;  %v226_v51 = vld [vmem:[#allocation5 + $0x440] sm:$0xff]  ;;  %v281_v13 = vld [vmem:[#allocation5 + $0x5f8] sm:$0xff] }
  0x42   :  { %408 = vmatpush.msrb.mxu0 %v238_v20  ;;  %427 = vmatpush.msrb.mxu1 %v272_v21  ;;  %v228_v46 = vld [vmem:[#allocation5 + $0x450] sm:$0xff]  ;;  %v258_v57 = vld [vmem:[#allocation5 + $0x540] sm:$0xff]  ;;  %v183_v15 = vld [vmem:[#allocation5 + $0x2e8] sm:$0xff] }
  0x43   :  { %449 = vmatpush.msrb.mxu2 %v109_v22  ;;  %468 = vmatpush.msrb.mxu3 %v143_v23  ;;  %v260_v52 = vld [vmem:[#allocation5 + $0x550] sm:$0xff]  ;;  %v222_v60 = vld [vmem:[#allocation5 + $0x420] sm:$0xff]  ;;  %v245_v17 = vld [vmem:[#allocation5 + $0x4d8] sm:$0xff] }
  0x44   :  { %409 = vmatpush.msrb.mxu0 %v236_v24  ;;  %428 = vmatpush.msrb.mxu1 %v270_v27  ;;  %v224_v56 = vld [vmem:[#allocation5 + $0x430] sm:$0xff]  ;;  %v254_v1 = vld [vmem:[#allocation5 + $0x520] sm:$0xff]  ;;  %v217_v18 = vld [vmem:[#allocation5 + $0x3f8] sm:$0xff] }
  0x45   :  { %450 = vmatpush.msrb.mxu2 %v107_v30  ;;  %469 = vmatpush.msrb.mxu3 %v141_v31  ;;  %v256_v61 = vld [vmem:[#allocation5 + $0x530] sm:$0xff]  ;;  %v218_v5 = vld [vmem:[#allocation5 + $0x400] sm:$0xff]  ;;  %v279_v19 = vld [vmem:[#allocation5 + $0x5e8] sm:$0xff] }
  0x46   :  { %410 = vmatpush.msrb.mxu0 %v234_v32  ;;  %429 = vmatpush.msrb.mxu1 %v268_v33  ;;  %v220_v0 = vld [vmem:[#allocation5 + $0x410] sm:$0xff]  ;;  %v860_v4 = vld.sshfl [vmem:[#allocation1 + $0x10] sm:$0xff pattern:$0x73625140]  ;;  %v250_v14 = vld [vmem:[#allocation5 + $0x500] sm:$0xff] }
  0x47   :  { %451 = vmatpush.msrb.mxu2 %v105_v34  ;;  %470 = vmatpush.msrb.mxu3 %v139_v35  ;;  %v252_v7 = vld [vmem:[#allocation5 + $0x510] sm:$0xff]  ;;  %v862_v9 = vld.sshfl [vmem:[#allocation1] sm:$0xff pattern:$0x73625140]  ;;  %v181_v20 = vld [vmem:[#allocation5 + $0x2d8] sm:$0xff] }
  0x48   :  { %411 = vmatpush.msrb.mxu0 %v232_v36  ;;  %430 = vmatpush.msrb.mxu1 %v266_v37  ;;  %v865_v10 = vld.sshfl [vmem:[#allocation1 + $0x18] sm:$0xff pattern:$0x73625140]  ;;  %v869_v16 = vld.sshfl [vmem:[#allocation1 + $0x8] sm:$0xff pattern:$0x73625140] }
  0x49   :  { %452 = vmatpush.msrb.mxu2 %v103_v38  ;;  %471 = vmatpush.msrb.mxu3 %v137_v39  ;;  %v243_v21 = vld [vmem:[#allocation5 + $0x4c8] sm:$0xff]  ;;  %v277_v23 = vld [vmem:[#allocation5 + $0x5d8] sm:$0xff]  ;;  %v874_v33 = vld.sshfl [vmem:[#allocation1 + $0x28] sm:$0xff pattern:$0x73625140] }
  0x4a   :  { %412 = vmatpush.msrb.mxu0 %v230_v40  ;;  %431 = vmatpush.msrb.mxu1 %v264_v41  ;;  %v215_v22 = vld [vmem:[#allocation5 + $0x3e8] sm:$0xff]  ;;  %v241_v25 = vld [vmem:[#allocation5 + $0x4b8] sm:$0xff] }
  0x4b   :  { %453 = vmatpush.msrb.mxu2 %v101_v42  ;;  %472 = vmatpush.msrb.mxu3 %v135_v43  ;;  %v179_v24 = vld [vmem:[#allocation5 + $0x2c8] sm:$0xff]  ;;  %v213_v26 = vld [vmem:[#allocation5 + $0x3d8] sm:$0xff] }
  0x4c   :  { %413 = vmatpush.msrb.mxu0 %v228_v46  ;;  %432 = vmatpush.msrb.mxu1 %v262_v47  ;;  %v275_v27 = vld [vmem:[#allocation5 + $0x5c8] sm:$0xff]  ;;  %v177_v30 = vld [vmem:[#allocation5 + $0x2b8] sm:$0xff] }
  0x4d   :  { %454 = vmatpush.msrb.mxu2 %v99_v48  ;;  %473 = vmatpush.msrb.mxu3 %v133_v49  ;;  %v872_v28 = vld.sshfl [vmem:[#allocation1 + $0x20] sm:$0xff pattern:$0x73625140]  ;;  %v273_v32 = vld [vmem:[#allocation5 + $0x5b8] sm:$0xff] }
  0x4e   :  { %414 = vmatpush.msrb.mxu0 %v226_v51  ;;  %433 = vmatpush.msrb.mxu1 %v260_v52  ;;  %v239_v29 = vld [vmem:[#allocation5 + $0x4a8] sm:$0xff]  ;;  %v209_v35 = vld [vmem:[#allocation5 + $0x3b8] sm:$0xff] }
  0x4f   :  { %455 = vmatpush.msrb.mxu2 %v97_v54  ;;  %474 = vmatpush.msrb.mxu3 %v131_v55  ;;  %v211_v31 = vld [vmem:[#allocation5 + $0x3c8] sm:$0xff]  ;;  %v237_v36 = vld [vmem:[#allocation5 + $0x498] sm:$0xff] }
  0x50   :  { %415 = vmatpush.msrb.mxu0 %v224_v56  ;;  %434 = vmatpush.msrb.mxu1 %v258_v57  ;;  %v175_v34 = vld [vmem:[#allocation5 + $0x2a8] sm:$0xff]  ;;  %v173_v38 = vld [vmem:[#allocation5 + $0x298] sm:$0xff] }
  0x51   :  { %456 = vmatpush.msrb.mxu2 %v95_v58  ;;  %475 = vmatpush.msrb.mxu3 %v129_v59  ;;  %v271_v37 = vld [vmem:[#allocation5 + $0x5a8] sm:$0xff]  ;;  %v269_v41 = vld [vmem:[#allocation5 + $0x598] sm:$0xff] }
  0x52   :  { %416 = vmatpush.msrb.mxu0 %v222_v60  ;;  %435 = vmatpush.msrb.mxu1 %v256_v61  ;;  %v207_v39 = vld [vmem:[#allocation5 + $0x3a8] sm:$0xff]  ;;  %v205_v43 = vld [vmem:[#allocation5 + $0x398] sm:$0xff] }
  0x53   :  { %457 = vmatpush.msrb.mxu2 %v93_v62  ;;  %476 = vmatpush.msrb.mxu3 %v127_v63  ;;  %v235_v40 = vld [vmem:[#allocation5 + $0x488] sm:$0xff]  ;;  %v233_v44 = vld [vmem:[#allocation5 + $0x478] sm:$0xff] }
  0x54   :  { %417 = vmatpush.msrb.mxu0 %v220_v0  ;;  %436 = vmatpush.msrb.mxu1 %v254_v1  ;;  %v171_v42 = vld [vmem:[#allocation5 + $0x288] sm:$0xff]  ;;  %v169_v46 = vld [vmem:[#allocation5 + $0x278] sm:$0xff] }
  0x55   :  { %458 = vmatpush.msrb.mxu2 %v91_v2  ;;  %477 = vmatpush.msrb.mxu3 %v125_v3  ;;  %v267_v45 = vld [vmem:[#allocation5 + $0x588] sm:$0xff]  ;;  %v265_v49 = vld [vmem:[#allocation5 + $0x578] sm:$0xff] }
  0x56   :  { %379 = vmatmul.f32.vlgmr.msra.gmra.mxu2 %v860_v4  ;;  %418 = vmatpush.msrb.mxu0 %v218_v5  ;;  %v203_v47 = vld [vmem:[#allocation5 + $0x388] sm:$0xff]  ;;  %v201_v51 = vld [vmem:[#allocation5 + $0x378] sm:$0xff] }
  0x57   :  { %523 = vmatpush.msra.mxu2 %v249_v6  ;;  %437 = vmatpush.msrb.mxu1 %v252_v7  ;;  %v231_v48 = vld [vmem:[#allocation5 + $0x468] sm:$0xff]  ;;  %v229_v52 = vld [vmem:[#allocation5 + $0x458] sm:$0xff] }
  0x58   :  { %478 = vmatpush.msrb.mxu3 %v123_v8  ;;  %339 = vmatmul.f32.vlgmr.msra.gmra.mxu0 %v862_v9  ;;  %v167_v50 = vld [vmem:[#allocation5 + $0x268] sm:$0xff]  ;;  %v165_v54 = vld [vmem:[#allocation5 + $0x258] sm:$0xff] }
  0x59   :  { %399 = vmatmul.f32.vlgmr.msra.gmra.mxu3 %v865_v10  ;;  %483 = vmatpush.msra.mxu0 %v185_v11  ;;  %v263_v53 = vld [vmem:[#allocation5 + $0x568] sm:$0xff]  ;;  %v261_v57 = vld [vmem:[#allocation5 + $0x558] sm:$0xff] }
  0x5a   :  { %524 = vmatpush.msra.mxu2 %v247_v12  ;;  %543 = vmatpush.msra.mxu3 %v281_v13  ;;  %v199_v55 = vld [vmem:[#allocation5 + $0x368] sm:$0xff]  ;;  %v197_v59 = vld [vmem:[#allocation5 + $0x358] sm:$0xff] }
  0x5b   :  { %438 = vmatpush.msrb.mxu1 %v250_v14  ;;  %484 = vmatpush.msra.mxu0 %v183_v15  ;;  %v227_v56 = vld [vmem:[#allocation5 + $0x448] sm:$0xff]  ;;  %v225_v60 = vld [vmem:[#allocation5 + $0x438] sm:$0xff] }
  0x5c   :  { %359 = vmatmul.f32.vlgmr.msra.gmra.mxu1 %v869_v16  ;;  %525 = vmatpush.msra.mxu2 %v245_v17  ;;  %v163_v58 = vld [vmem:[#allocation5 + $0x248] sm:$0xff]  ;;  %v161_v62 = vld [vmem:[#allocation5 + $0x238] sm:$0xff] }
  0x5d   :  { %503 = vmatpush.msra.mxu1 %v217_v18  ;;  %544 = vmatpush.msra.mxu3 %v279_v19  ;;  %v259_v61 = vld [vmem:[#allocation5 + $0x548] sm:$0xff]  ;;  %v257_v1 = vld [vmem:[#allocation5 + $0x538] sm:$0xff] }
  0x5e   :  { %485 = vmatpush.msra.mxu0 %v181_v20  ;;  %526 = vmatpush.msra.mxu2 %v243_v21  ;;  %v195_v63 = vld [vmem:[#allocation5 + $0x348] sm:$0xff]  ;;  %v193_v3 = vld [vmem:[#allocation5 + $0x338] sm:$0xff] }
  0x5f   :  { %504 = vmatpush.msra.mxu1 %v215_v22  ;;  %545 = vmatpush.msra.mxu3 %v277_v23  ;;  %v223_v0 = vld [vmem:[#allocation5 + $0x428] sm:$0xff]  ;;  %v221_v5 = vld [vmem:[#allocation5 + $0x418] sm:$0xff] }
  0x60   :  { %486 = vmatpush.msra.mxu0 %v179_v24  ;;  %527 = vmatpush.msra.mxu2 %v241_v25  ;;  %v159_v2 = vld [vmem:[#allocation5 + $0x228] sm:$0xff]  ;;  %v157_v7 = vld [vmem:[#allocation5 + $0x218] sm:$0xff] }
  0x61   :  { %505 = vmatpush.msra.mxu1 %v213_v26  ;;  %546 = vmatpush.msra.mxu3 %v275_v27  ;;  %v255_v6 = vld [vmem:[#allocation5 + $0x528] sm:$0xff]  ;;  %v253_v11 = vld [vmem:[#allocation5 + $0x518] sm:$0xff] }
  0x62   :  { %419 = vmatmul.f32.vlgmr.msrb.gmra.mxu0 %v872_v28  ;;  %528 = vmatpush.msra.mxu2 %v239_v29  ;;  %v191_v8 = vld [vmem:[#allocation5 + $0x328] sm:$0xff]  ;;  %v189_v13 = vld [vmem:[#allocation5 + $0x318] sm:$0xff] }
  0x63   :  { %487 = vmatpush.msra.mxu0 %v177_v30  ;;  %506 = vmatpush.msra.mxu1 %v211_v31  ;;  %v155_v12 = vld [vmem:[#allocation5 + $0x208] sm:$0xff]  ;;  %v579_v17 = vld [vmem:[#allocation8 + $0x70] sm:$0xff]  ;;  %v576_v20 = vld [vmem:[#allocation8 + $0x58] sm:$0xff] }
  0x64   :  { %547 = vmatpush.msra.mxu3 %v273_v32  ;;  %439 = vmatmul.f32.vlgmr.msrb.gmra.mxu1 %v874_v33  ;;  %v251_v14 = vld [vmem:[#allocation5 + $0x508] sm:$0xff]  ;;  %v575_v21 = vld [vmem:[#allocation8 + $0x50] sm:$0xff]  ;;  %v568_v26 = vld [vmem:[#allocation8 + $0x18] sm:$0xff] }
  0x65   :  { %488 = vmatpush.msra.mxu0 %v175_v34  ;;  %507 = vmatpush.msra.mxu1 %v209_v35  ;;  %v187_v15 = vld [vmem:[#allocation5 + $0x308] sm:$0xff]  ;;  %v571_v24 = vld [vmem:[#allocation8 + $0x30] sm:$0xff]  ;;  %v592_v34 = vld [vmem:[#allocation8 + $0xd8] sm:$0xff] }
  0x66   :  { %529 = vmatpush.msra.mxu2 %v237_v36  ;;  %548 = vmatpush.msra.mxu3 %v271_v37  ;;  %v578_v18 = vld [vmem:[#allocation8 + $0x68] sm:$0xff]  ;;  %v577_v19 = vld [vmem:[#allocation8 + $0x60] sm:$0xff]  ;;  %v567_v27 = vld [vmem:[#allocation8 + $0x10] sm:$0xff] }
  0x67   :  { %489 = vmatpush.msra.mxu0 %v173_v38  ;;  %508 = vmatpush.msra.mxu1 %v207_v39  ;;  %v574_v22 = vld [vmem:[#allocation8 + $0x48] sm:$0xff]  ;;  %v573_v23 = vld [vmem:[#allocation8 + $0x40] sm:$0xff]  ;;  %v595_v30 = vld [vmem:[#allocation8 + $0xf0] sm:$0xff] }
  0x68   :  { %530 = vmatpush.msra.mxu2 %v235_v40  ;;  %549 = vmatpush.msra.mxu3 %v269_v41  ;;  %v570_v25 = vld [vmem:[#allocation8 + $0x28] sm:$0xff]  ;;  %v565_v31 = vld [vmem:[#allocation8] sm:$0xff]  ;;  %v591_v35 = vld [vmem:[#allocation8 + $0xd0] sm:$0xff] }
  0x69   :  { %490 = vmatpush.msra.mxu0 %v171_v42  ;;  %509 = vmatpush.msra.mxu1 %v205_v43  ;;  %v566_v29 = vld [vmem:[#allocation8 + $0x8] sm:$0xff]  ;;  %v282_v37 = vld [vmem:[#allocation7] sm:$0x3]  ;;  %v589_v38 = vld [vmem:[#allocation8 + $0xc0] sm:$0xff] }
  0x6a   :  { %531 = vmatpush.msra.mxu2 %v233_v44  ;;  %550 = vmatpush.msra.mxu3 %v267_v45  ;;  %v594_v32 = vld [vmem:[#allocation8 + $0xe8] sm:$0xff]  ;;  %v284_v39 = vperm.slane %v282_v37, 0  ;;  %v588_v40 = vld [vmem:[#allocation8 + $0xb8] sm:$0xff]  ;;  %v587_v43 = vld [vmem:[#allocation8 + $0xb0] sm:$0xff] }
  0x6b   :  { %491 = vmatpush.msra.mxu0 %v169_v46  ;;  %510 = vmatpush.msra.mxu1 %v203_v47  ;;  %v590_v36 = vld [vmem:[#allocation8 + $0xc8] sm:$0xff] }
  0x6c   :  { %532 = vmatpush.msra.mxu2 %v231_v48  ;;  %551 = vmatpush.msra.mxu3 %v265_v49  ;;  %v586_v44 = vld [vmem:[#allocation8 + $0xa8] sm:$0xff]  ;;  %v585_v48 = vld [vmem:[#allocation8 + $0xa0] sm:$0xff] }
  0x6d   :  { %492 = vmatpush.msra.mxu0 %v167_v50  ;;  %511 = vmatpush.msra.mxu1 %v201_v51  ;;  %v584_v51 = vld [vmem:[#allocation8 + $0x98] sm:$0xff] }
  0x6e   :  { %533 = vmatpush.msra.mxu2 %v229_v52  ;;  %552 = vmatpush.msra.mxu3 %v263_v53  ;;  %v583_v53 = vld [vmem:[#allocation8 + $0x90] sm:$0xff] }
  0x6f   :  { %493 = vmatpush.msra.mxu0 %v165_v54  ;;  %512 = vmatpush.msra.mxu1 %v199_v55 }
  0x70   :  { %534 = vmatpush.msra.mxu2 %v227_v56  ;;  %553 = vmatpush.msra.mxu3 %v261_v57  ;;  %v582_v56 = vld [vmem:[#allocation8 + $0x88] sm:$0xff] }
  0x71   :  { %459 = vmatmul.f32.vlgmr.msrb.gmra.mxu2 %v862_v9  ;;  %494 = vmatpush.msra.mxu0 %v163_v58  ;;  %v219_v9 = vld [vmem:[#allocation5 + $0x408] sm:$0xff] }
  0x72   :  { %513 = vmatpush.msra.mxu1 %v197_v59  ;;  %535 = vmatpush.msra.mxu2 %v225_v60  ;;  %v581_v59 = vld [vmem:[#allocation8 + $0x80] sm:$0xff] }
  0x73   :  { %554 = vmatpush.msra.mxu3 %v259_v61  ;;  %495 = vmatpush.msra.mxu0 %v161_v62  ;;  %v285_v61 = vperm.slane %v282_v37, 1 }
  0x74   :  { %479 = vmatmul.f32.vlgmr.msrb.gmra.mxu3 %v869_v16  ;;  %514 = vmatpush.msra.mxu1 %v195_v63  ;;  %v580_v16 = vld [vmem:[#allocation8 + $0x78] sm:$0xff] }
  0x75   :  { %536 = vmatpush.msra.mxu2 %v223_v0  ;;  %555 = vmatpush.msra.mxu3 %v257_v1 }
  0x76   :  { %496 = vmatpush.msra.mxu0 %v159_v2  ;;  %515 = vmatpush.msra.mxu1 %v193_v3 }
  0x77   :  { %537 = vmatpush.msra.mxu2 %v221_v5  ;;  %556 = vmatpush.msra.mxu3 %v255_v6 }
  0x78   :  { %497 = vmatpush.msra.mxu0 %v157_v7  ;;  %516 = vmatpush.msra.mxu1 %v191_v8 }
  0x79   :  { %538 = vmatpush.msra.mxu2 %v219_v9  ;;  %557 = vmatpush.msra.mxu3 %v253_v11 }
  0x7a   :  { %539 = vmatmul.f32.vlgmr.msra.gmra.mxu2 %v872_v28  ;;  %498 = vmatpush.msra.mxu0 %v155_v12  ;;  %v596_v28 = vld [vmem:[#allocation8 + $0xf8] sm:$0xff] }
  0x7b   :  { %517 = vmatpush.msra.mxu1 %v189_v13  ;;  %558 = vmatpush.msra.mxu3 %v251_v14  ;;  %v676_v13 = vld [vmem:[%s894_s4] ss:$0 sm:$0xff] }
  0x7c   :  { %499 = vmatmul.f32.vlgmr.msra.gmra.mxu0 %v860_v4  ;;  %559 = vmatmul.f32.vlgmr.msra.gmra.mxu3 %v874_v33  ;;  %v572_v4 = vld [vmem:[#allocation8 + $0x38] sm:$0xff]  ;;  %v593_v33 = vld [vmem:[#allocation8 + $0xe0] sm:$0xff] }
  0x7d   :  { %518 = vmatpush.msra.mxu1 %v187_v15  ;;  %601 = vmatpush.msrb.mxu0 %v580_v16 }
  0x7e   :  { %519 = vmatmul.f32.vlgmr.msra.gmra.mxu1 %v865_v10  ;;  %v569_v10 = vld [vmem:[#allocation8 + $0x20] sm:$0xff] }
  0x7f   :  { %602 = vmatpush.msrb.mxu0 %v579_v17  ;;  %621 = vmatpush.msrb.mxu1 %v596_v28 }
  0x81   :  { %603 = vmatpush.msrb.mxu0 %v578_v18  ;;  %622 = vmatpush.msrb.mxu1 %v595_v30 }
  0x83   :  { %604 = vmatpush.msrb.mxu0 %v577_v19  ;;  %623 = vmatpush.msrb.mxu1 %v594_v32 }
  0x85   :  { %605 = vmatpush.msrb.mxu0 %v576_v20  ;;  %624 = vmatpush.msrb.mxu1 %v593_v33 }
  0x87   :  { %606 = vmatpush.msrb.mxu0 %v575_v21  ;;  %625 = vmatpush.msrb.mxu1 %v592_v34 }
  0x89   :  { %607 = vmatpush.msrb.mxu0 %v574_v22  ;;  %626 = vmatpush.msrb.mxu1 %v591_v35 }
  0x8b   :  { %608 = vmatpush.msrb.mxu0 %v573_v23  ;;  %627 = vmatpush.msrb.mxu1 %v590_v36 }
  0x8d   :  { %609 = vmatpush.msrb.mxu0 %v572_v4  ;;  %628 = vmatpush.msrb.mxu1 %v589_v38 }
  0x8f   :  { %610 = vmatpush.msrb.mxu0 %v571_v24  ;;  %629 = vmatpush.msrb.mxu1 %v588_v40 }
  0x91   :  { %611 = vmatpush.msrb.mxu0 %v570_v25  ;;  %630 = vmatpush.msrb.mxu1 %v587_v43 }
  0x93   :  { %612 = vmatpush.msrb.mxu0 %v569_v10  ;;  %631 = vmatpush.msrb.mxu1 %v586_v44 }
  0x95   :  { %613 = vmatpush.msrb.mxu0 %v568_v26  ;;  %632 = vmatpush.msrb.mxu1 %v585_v48 }
  0x97   :  { %614 = vmatpush.msrb.mxu0 %v567_v27  ;;  %633 = vmatpush.msrb.mxu1 %v584_v51 }
  0x99   :  { %615 = vmatpush.msrb.mxu0 %v566_v29  ;;  %634 = vmatpush.msrb.mxu1 %v583_v53 }
  0x9b   :  { %616 = vmatpush.msrb.mxu0 %v565_v31  ;;  %635 = vmatpush.msrb.mxu1 %v582_v56 }
  0x9d   :  { %636 = vmatpush.msrb.mxu1 %v581_v59 }
  0xd5   :  { %v340_v41 = vpop.f32.mrf.mxu0 }
  0xd6   :  { %v341_v42 = vadd.f32 %v340_v41, %v284_v39 }
  0xd9   :  { %v360_v45 = vpop.f32.mrf.mxu1  ;;  %v380_v46 = vpop.f32.mrf.mxu2 }
  0xda   :  { %v361_v47 = vadd.f32 %v360_v45, %v341_v42 }
  0xdc   :  { %v381_v49 = vadd.f32 %v380_v46, %v361_v47  ;;  %v400_v50 = vpop.f32.mrf.mxu3 }
  0xde   :  { %v401_v52 = vadd.f32 %v400_v50, %v381_v49 }
  0xdf   :  { %v420_v54 = vpop.f32.mrf.mxu0 }
  0xe0   :  { %v421_v55 = vadd.f32 %v420_v54, %v401_v52 }
  0xe1   :  { %v440_v57 = vpop.f32.mrf.mxu1 }
  0xe2   :  { %v441_v58 = vadd.f32 %v440_v57, %v421_v55 }
  0xe4   :  { %v563_v60 = vmax.f32 %v441_v58, 0.0 }
  0xe6   :  { %617 = vmatmul.f32.vlgmr.msrb.gmra.mxu0 %v563_v60 }
  0xf4   :  { %v460_v62 = vpop.f32.mrf.mxu2 }
  0xf5   :  { %v461_v63 = vadd.f32 %v460_v62, %v285_v61 }
  0xf7   :  { %v480_v0 = vpop.f32.mrf.mxu3 }
  0xf8   :  { %v481_v1 = vadd.f32 %v480_v0, %v461_v63 }
  0xf9   :  { %v500_v2 = vpop.f32.mrf.mxu0 }
  0xfa   :  { %v501_v3 = vadd.f32 %v500_v2, %v481_v1 }
  0xfb   :  { %v520_v5 = vpop.f32.mrf.mxu1 }
  0xfc   :  { %v521_v6 = vadd.f32 %v520_v5, %v501_v3 }
  0xfd   :  { %v540_v7 = vpop.f32.mrf.mxu2 }
  0xfe   :  { %v541_v8 = vadd.f32 %v540_v7, %v521_v6 }
  0xff   :  { %v560_v9 = vpop.f32.mrf.mxu3 }
 0x100   :  { %v561_v11 = vadd.f32 %v560_v9, %v541_v8 }
 0x102   :  { %v564_v12 = vmax.f32 %v561_v11, 0.0 }
 0x104   :  { %637 = vmatmul.f32.vlgmr.msrb.gmra.mxu1 %v564_v12 }
 0x163   :  { %v618_v14 = vpop.f32.mrf.mxu0 }
 0x164   :  { %v619_v15 = vadd.f32 %v676_v13, %v618_v14 }
 0x181   :  { %v638_v16 = vpop.f32.mrf.mxu1 }
 0x182   :  { %v639_v17 = vadd.f32 %v638_v16, %v619_v15 }
 0x184   :  { %641 = vst [vmem:[#allocation10] sm:$0xff] %v639_v17 }
 0x185   :  { %645 = vsyncadd [#allocation4], 96  ;;  %s648_s19 = sshll.u32 %s895_s5, 4  ;;  %s815_s20 = smov [#allocation10]   ;;  %s649_s19 = int_to_ptr.hbm [resolvable:$true] %s648_s19 }
 0x186   :  { %s646_s21 = sshll.u32 %s815_s20, 4  ;;  %s816_s22 = smov 32   ;;  %s647_s21 = int_to_ptr.vmem [resolvable:$true] %s646_s21 }
 0x187   :  { %s817_s23 = smov 2  }
 0x188   :  { %654 = dma.vmem_to_hbm [thread:$0]  %s647_s21, 32, %s649_s19, [#allocation4], %s816_s22, %s816_s22, %s817_s23  }
 0x189   :  { %803 = dma.done.wait [#allocation4], 128  }
 0x18a   :  { %804 = vsyncadd [#allocation4], 4294967168 }
 0x18b   :  { %659 = vsyncpa [#allocation3], 1 }
 0x18c   :  { %660 = vsyncpa [#allocation6], 1 }
 0x18d   :  { %661 = vsyncpa [#allocation9], 1 }
 0x18e   :  { %662 = vsyncpa [#allocation4], 1 }

</bundles_post_ra>
